<compile_context>
chip_gen: v6e
topology: v6e:2x2x1
jax: 0.10.0
libtpu: 0.0.40
codegen_flags: <defaults>
</compile_context>

<pallas_src>
import functools

import jax
import jax.numpy as jnp
from jax import lax
from jax.experimental import pallas as pl
from jax.experimental.pallas import tpu as pltpu


def _frame_similarity_kernel(feat_ref, wproj_ref, wfc_ref, bfc_ref, out_ref,
                             band_ref, *, seq_len, lookup_window):
    """One grid step = one block of whole clips packed along the row axis.

    feat_ref : (Mb, C)        spatially pooled features, Mb = batch_block * T
    wproj_ref: (C, D_pad)     projection weight (bias=False), zero-padded cols
    wfc_ref  : (L_pad, O_pad) fc weight, zero-padded on both axes
    bfc_ref  : (1, O_pad)     fc bias, zero-padded
    out_ref  : (Mb, O_pad)    relu(fc(band)) output (lane-dense)
    band_ref : (Mb, L_pad)    VMEM scratch holding the similarity band
    """
    T = seq_len
    L = lookup_window
    r = (L - 1) // 2
    M = feat_ref.shape[0]
    L_pad = band_ref.shape[1]

    # Projection (Linear, bias=False): one MXU matmul over all packed rows,
    # native input dtype, f32 accumulation.
    proj = jnp.dot(feat_ref[...], wproj_ref[...],
                   preferred_element_type=jnp.float32)            # (M, D_pad)

    # F.normalize(p=2, dim=-1): x * rsqrt(max(||x||^2, eps^2))  (EUP rsqrt).
    ss = jnp.sum(proj * proj, axis=-1, keepdims=True)             # (M, 1)
    inv = lax.rsqrt(jnp.maximum(ss, 1e-24))
    proj = proj * inv

    # Local frame index of each packed row (clips stacked along rows).
    t_local = lax.broadcasted_iota(jnp.int32, (M, 1), 0) % T

    # Zero the band's padding lanes every step (cheap, and safe under megacore
    # grid sharding, unlike a program_id==0-only init); live lanes [0, L) are
    # all overwritten below.
    if L_pad > L:
        band_ref[:, L:] = jnp.zeros((M, L_pad - L), jnp.float32)

    # Diagonal (d == 0): <proj[t], proj[t]> == ss / max(ss, eps).
    band_ref[:, r:r + 1] = ss * (inv * inv)

    # Off-diagonal offsets. For +d: one (M, D_pad) sublane roll + lane reduce.
    # For -d: reuse symmetry <p[t], p[t-d]> = <p[t-d], p[t]> and roll the
    # finished (M, 1) column instead of re-rolling / re-reducing (M, D_pad).
    # Rolling across the merged batch*T row axis is safe: any row whose
    # partner crosses a clip boundary is masked to zero.
    # TODO(synk): for lookup_window ~ 101 switch this static unroll to a
    # lax.fori_loop over d with a dynamic-shift pltpu.roll to bound code size.
    for d in range(1, r + 1):
        if d % M == 0:
            partner = proj                     # fully masked below anyway
        else:
            partner = pltpu.roll(proj, shift=(M - d) % M, axis=0)
        raw = jnp.sum(proj * partner, axis=-1, keepdims=True)     # (M, 1)
        col_plus = jnp.where(t_local + d < T, raw, 0.0)
        band_ref[:, r + d:r + d + 1] = col_plus
        if d % M == 0:
            shifted = col_plus
        else:
            shifted = pltpu.roll(col_plus, shift=d % M, axis=0)
        band_ref[:, r - d:r - d + 1] = jnp.where(t_local >= d, shifted, 0.0)

    # Band -> fc on the MXU, bias add + relu on the VPU.
    out = jnp.dot(band_ref[...], wfc_ref[...],
                  preferred_element_type=jnp.float32)             # (M, O_pad)
    out = jnp.maximum(out + bfc_ref[...], 0.0)
    out_ref[...] = out.astype(out_ref.dtype)


def _pick_batch_block(B, T):
    """Largest divisor of B giving >= 2 grid steps, Mb % 8 == 0, Mb <= 2048."""
    cands = [d for d in range(1, B + 1) if B % d == 0 and (d * T) % 8 == 0]
    pref = [d for d in cands if B // d >= 2 and d * T <= 2048]
    if pref:
        return max(pref)
    if cands:
        return max(cands)
    return B          # Mb == B*T is the full extent, always a legal block


def frame_similarity(inputs, w_proj, w_fc, b_fc, lookup_window,
                     batch_block=None, out_dtype=jnp.float32):
    """inputs: list of arrays shaped (B, Ci, T, H, W) (like the PyTorch module)."""
    assert lookup_window % 2 == 1, "`lookup_window` must be odd integer"

    # Hoisted out of the kernel: spatial mean, channel concat, transpose.
    pooled = jnp.concatenate([jnp.mean(t, axis=(3, 4)) for t in inputs],
                             axis=1)                               # (B, C, T)
    B, C, T = pooled.shape
    feat = jnp.transpose(pooled, (0, 2, 1)).reshape(B * T, C)      # (B*T, C)

    Cw, D = w_proj.shape
    L, O = w_fc.shape
    assert L == lookup_window
    assert Cw == C

    pad128 = lambda n: ((n + 127) // 128) * 128
    D_pad, L_pad, O_pad = pad128(D), pad128(L), pad128(O)

    # Lane-dense weights: zero-pad projection / fc dims to multiples of 128.
    w_proj_p = jnp.pad(w_proj, ((0, 0), (0, D_pad - D)))
    w_fc_p = jnp.pad(w_fc, ((0, L_pad - L), (0, O_pad - O)))
    b_fc_p = jnp.pad(b_fc.reshape(1, O), ((0, 0), (0, O_pad - O)))

    if batch_block is None:
        batch_block = _pick_batch_block(B, T)
    assert B % batch_block == 0
    Mb = batch_block * T
    assert Mb % 8 == 0 or Mb == B * T, (
        "batch_block*T must be a multiple of 8 (or cover the full batch)")

    kernel = functools.partial(_frame_similarity_kernel,
                               seq_len=T, lookup_window=L)

    # TODO(synk): when output_dim << 128, the zero-padded f32 writeback is the
    # dominant HBM stream; pass out_dtype=jnp.bfloat16 (or pack rows) to halve it.
    out = pl.pallas_call(
        kernel,
        out_shape=jax.ShapeDtypeStruct((B * T, O_pad), out_dtype),
        grid=(B // batch_block,),
        in_specs=[
            pl.BlockSpec((Mb, C), lambda i: (i, 0)),
            # Resident weights (constant index_map); their double-buffer is
            # accounted for in the <=2048-row block budget.
            pl.BlockSpec((C, D_pad), lambda i: (0, 0)),
            pl.BlockSpec((L_pad, O_pad), lambda i: (0, 0)),
            pl.BlockSpec((1, O_pad), lambda i: (0, 0)),
        ],
        out_specs=pl.BlockSpec((Mb, O_pad), lambda i: (i, 0)),
        scratch_shapes=[pltpu.VMEM((Mb, L_pad), jnp.float32)],
        compiler_params=pltpu.CompilerParams(
            dimension_semantics=("parallel",)),
    )(feat, w_proj_p, w_fc_p, b_fc_p)

    return out[:, :O].reshape(B, T, O)


def frame_similarity_reference(inputs, w_proj, w_fc, b_fc, lookup_window):
    """Plain-JAX port of the PyTorch forward, for verification."""
    x = jnp.concatenate([jnp.mean(t, axis=(3, 4)) for t in inputs], axis=1)  # (B,C,T)
    x = jnp.transpose(x, (0, 2, 1))                                          # (B,T,C)
    x = x @ w_proj                                                           # (B,T,D)
    x = x / jnp.maximum(jnp.linalg.norm(x, axis=2, keepdims=True), 1e-12)
    sim = jnp.einsum("btd,bsd->bts", x, x)                                   # (B,T,T)
    r = (lookup_window - 1) // 2
    simp = jnp.pad(sim, ((0, 0), (0, 0), (r, r)))
    T = x.shape[1]
    t_idx = jnp.arange(T)[:, None]
    l_idx = jnp.arange(lookup_window)[None, :]
    band = simp[:, t_idx, t_idx + l_idx]                                     # (B,T,L)
    return jax.nn.relu(band @ w_fc + b_fc)


if __name__ == "__main__":
    key = jax.random.PRNGKey(0)

    # Small, module-consistent shapes.
    B, T, H, W = 2, 8, 8, 8
    channels = (4, 4)                    # two feature maps, concatenated on C
    in_filters = sum(channels)           # 8
    similarity_dim = 32
    lookup_window = 11                   # must be odd
    output_dim = 32

    n_keys = len(channels) + 3
    keys = jax.random.split(key, n_keys)

    inputs = [
        jax.random.normal(keys[i], (B, c, T, H, W), dtype=jnp.float32)
        for i, c in enumerate(channels)
    ]
    w_proj = 0.1 * jax.random.normal(keys[-3], (in_filters, similarity_dim),
                                     dtype=jnp.float32)
    w_fc = 0.1 * jax.random.normal(keys[-2], (lookup_window, output_dim),
                                   dtype=jnp.float32)
    b_fc = 0.1 * jax.random.normal(keys[-1], (output_dim,), dtype=jnp.float32)

    out = frame_similarity(inputs, w_proj, w_fc, b_fc, lookup_window)
    out = jax.block_until_ready(out)

    ref = frame_similarity_reference(inputs, w_proj, w_fc, b_fc, lookup_window)
    assert out.shape == (B, T, output_dim), out.shape
    assert jnp.allclose(out, ref, rtol=1e-2, atol=1e-2), (
        float(jnp.max(jnp.abs(out - ref))))

    print("KERNEL_OK")
</pallas_src>

<mosaic_0001>
module attributes {stable_mosaic.version = 11 : i64} {
  func.func @_frame_similarity_kernel(%arg0: i32, %arg1: memref<8x8xf32, #tpu.memory_space<vmem>>, %arg2: memref<8x128xf32, #tpu.memory_space<vmem>>, %arg3: memref<128x128xf32, #tpu.memory_space<vmem>>, %arg4: memref<1x128xf32, #tpu.memory_space<vmem>>, %arg5: memref<8x128xf32, #tpu.memory_space<vmem>>, %arg6: memref<8x128xf32, #tpu.memory_space<vmem>>) attributes {dimension_semantics = [#tpu.dimension_semantics<parallel>], iteration_bounds = array<i64: 2>, scalar_prefetch = 0 : i64, scratch_operands = 1 : i64, tpu.core_type = #tpu.core_type<tc>, window_params = [{transform_indices = @transform_0, window_bounds = array<i64: 8, 8>}, {pipeline_mode = #tpu.pipeline_mode<synchronous>, transform_indices = @transform_1, window_bounds = array<i64: 8, 128>}, {pipeline_mode = #tpu.pipeline_mode<synchronous>, transform_indices = @transform_2, window_bounds = array<i64: 128, 128>}, {pipeline_mode = #tpu.pipeline_mode<synchronous>, transform_indices = @transform_3, window_bounds = array<i64: 1, 128>}, {transform_indices = @transform_4, window_bounds = array<i64: 8, 128>}]} {
    %c0 = arith.constant 0 : index
    %c0_0 = arith.constant 0 : index
    %0 = vector.load %arg1[%c0, %c0_0] : memref<8x8xf32, #tpu.memory_space<vmem>>, vector<8x8xf32>
    %c0_1 = arith.constant 0 : index
    %c0_2 = arith.constant 0 : index
    %1 = vector.load %arg2[%c0_1, %c0_2] : memref<8x128xf32, #tpu.memory_space<vmem>>, vector<8x128xf32>
    %cst = arith.constant dense<0.000000e+00> : vector<8x128xf32>
    %2 = tpu.matmul %0, %1, %cst {dimension_numbers = #tpu.dot_dimension_numbers<[1], [0], [0], [1], [0, 0, 1, 1], [], []>} : vector<8x8xf32>, vector<8x128xf32>, vector<8x128xf32> -> vector<8x128xf32>
    %3 = arith.mulf %2, %2 : vector<8x128xf32>
    %cst_3 = arith.constant dense<0.000000e+00> : vector<8xf32>
    %4 = vector.multi_reduction <add>, %3, %cst_3 [1] : vector<8x128xf32> to vector<8xf32>
    %5 = vector.shape_cast %4 : vector<8xf32> to vector<8x1xf32>
    %cst_4 = arith.constant 1.000000e-24 : f32
    %6 = vector.broadcast %cst_4 : f32 to vector<8x1xf32>
    %7 = arith.maximumf %5, %6 : vector<8x1xf32>
    %8 = math.rsqrt %7 : vector<8x1xf32>
    %9 = vector.broadcast %8 : vector<8x1xf32> to vector<8x128xf32>
    %10 = arith.mulf %2, %9 : vector<8x128xf32>
    %11 = tpu.iota {dimensions = array<i32: 0>} : vector<8x1xi32>
    %c8_i32 = arith.constant 8 : i32
    %c0_i32 = arith.constant 0 : i32
    %12 = arith.cmpi eq, %c8_i32, %c0_i32 : i32
    %c1_i32 = arith.constant 1 : i32
    %13 = arith.select %12, %c1_i32, %c8_i32 : i32
    %14 = vector.broadcast %13 : i32 to vector<8x1xi32>
    %15 = arith.remsi %11, %14 : vector<8x1xi32>
    %c0_i32_5 = arith.constant 0 : i32
    %16 = vector.broadcast %c0_i32_5 : i32 to vector<8x1xi32>
    %17 = arith.cmpi ne, %15, %16 : vector<8x1xi32>
    %c0_i32_6 = arith.constant 0 : i32
    %18 = vector.broadcast %c0_i32_6 : i32 to vector<8x1xi32>
    %19 = arith.cmpi slt, %15, %18 : vector<8x1xi32>
    %c0_i32_7 = arith.constant 0 : i32
    %20 = arith.cmpi slt, %13, %c0_i32_7 : i32
    %21 = vector.broadcast %20 : i1 to vector<8x1xi1>
    %22 = vector.broadcast %21 : vector<8x1xi1> to vector<8x1xi1>
    %23 = arith.xori %19, %22 : vector<8x1xi1>
    %24 = arith.andi %23, %17 : vector<8x1xi1>
    %25 = vector.broadcast %13 : i32 to vector<8x1xi32>
    %26 = arith.addi %15, %25 : vector<8x1xi32>
    %27 = arith.select %24, %26, %15 : vector<8x1xi1>, vector<8x1xi32>
    %cst_8 = arith.constant 0.000000e+00 : f32
    %28 = vector.broadcast %cst_8 : f32 to vector<8x117xf32>
    %c0_9 = arith.constant 0 : index
    %c11 = arith.constant 11 : index
    %29 = vector.load %arg6[%c0_9, %c11] : memref<8x128xf32, #tpu.memory_space<vmem>>, vector<8x117xf32>
    tpu.vector_store %arg6[%c0_9, %c11], %28 {strides = array<i32>} : memref<8x128xf32, #tpu.memory_space<vmem>>, vector<8x117xf32>,
    %30 = arith.mulf %8, %8 : vector<8x1xf32>
    %31 = arith.mulf %5, %30 : vector<8x1xf32>
    %c0_10 = arith.constant 0 : index
    %c5 = arith.constant 5 : index
    %32 = vector.load %arg6[%c0_10, %c5] : memref<8x128xf32, #tpu.memory_space<vmem>>, vector<8x1xf32>
    tpu.vector_store %arg6[%c0_10, %c5], %31 {strides = array<i32>} : memref<8x128xf32, #tpu.memory_space<vmem>>, vector<8x1xf32>,
    %c7_i32 = arith.constant 7 : i32
    %33 = tpu.dynamic_rotate %10 by %c7_i32 dim 0 : vector<8x128xf32>, i32 -> vector<8x128xf32>
    %34 = arith.mulf %10, %33 : vector<8x128xf32>
    %cst_11 = arith.constant dense<0.000000e+00> : vector<8xf32>
    %35 = vector.multi_reduction <add>, %34, %cst_11 [1] : vector<8x128xf32> to vector<8xf32>
    %36 = vector.shape_cast %35 : vector<8xf32> to vector<8x1xf32>
    %c1_i32_12 = arith.constant 1 : i32
    %37 = vector.broadcast %c1_i32_12 : i32 to vector<8x1xi32>
    %38 = arith.addi %27, %37 : vector<8x1xi32>
    %c8_i32_13 = arith.constant 8 : i32
    %39 = vector.broadcast %c8_i32_13 : i32 to vector<8x1xi32>
    %40 = arith.cmpi slt, %38, %39 : vector<8x1xi32>
    %cst_14 = arith.constant 0.000000e+00 : f32
    %41 = vector.broadcast %cst_14 : f32 to vector<8x1xf32>
    %42 = arith.select %40, %36, %41 : vector<8x1xi1>, vector<8x1xf32>
    %c0_15 = arith.constant 0 : index
    %c6 = arith.constant 6 : index
    %43 = vector.load %arg6[%c0_15, %c6] : memref<8x128xf32, #tpu.memory_space<vmem>>, vector<8x1xf32>
    tpu.vector_store %arg6[%c0_15, %c6], %42 {strides = array<i32>} : memref<8x128xf32, #tpu.memory_space<vmem>>, vector<8x1xf32>,
    %c1_i32_16 = arith.constant 1 : i32
    %44 = tpu.dynamic_rotate %42 by %c1_i32_16 dim 0 : vector<8x1xf32>, i32 -> vector<8x1xf32>
    %c1_i32_17 = arith.constant 1 : i32
    %45 = vector.broadcast %c1_i32_17 : i32 to vector<8x1xi32>
    %46 = arith.cmpi sge, %27, %45 : vector<8x1xi32>
    %cst_18 = arith.constant 0.000000e+00 : f32
    %47 = vector.broadcast %cst_18 : f32 to vector<8x1xf32>
    %48 = arith.select %46, %44, %47 : vector<8x1xi1>, vector<8x1xf32>
    %c0_19 = arith.constant 0 : index
    %c4 = arith.constant 4 : index
    %49 = vector.load %arg6[%c0_19, %c4] : memref<8x128xf32, #tpu.memory_space<vmem>>, vector<8x1xf32>
    tpu.vector_store %arg6[%c0_19, %c4], %48 {strides = array<i32>} : memref<8x128xf32, #tpu.memory_space<vmem>>, vector<8x1xf32>,
    %c6_i32 = arith.constant 6 : i32
    %50 = tpu.dynamic_rotate %10 by %c6_i32 dim 0 : vector<8x128xf32>, i32 -> vector<8x128xf32>
    %51 = arith.mulf %10, %50 : vector<8x128xf32>
    %cst_20 = arith.constant dense<0.000000e+00> : vector<8xf32>
    %52 = vector.multi_reduction <add>, %51, %cst_20 [1] : vector<8x128xf32> to vector<8xf32>
    %53 = vector.shape_cast %52 : vector<8xf32> to vector<8x1xf32>
    %c2_i32 = arith.constant 2 : i32
    %54 = vector.broadcast %c2_i32 : i32 to vector<8x1xi32>
    %55 = arith.addi %27, %54 : vector<8x1xi32>
    %c8_i32_21 = arith.constant 8 : i32
    %56 = vector.broadcast %c8_i32_21 : i32 to vector<8x1xi32>
    %57 = arith.cmpi slt, %55, %56 : vector<8x1xi32>
    %cst_22 = arith.constant 0.000000e+00 : f32
    %58 = vector.broadcast %cst_22 : f32 to vector<8x1xf32>
    %59 = arith.select %57, %53, %58 : vector<8x1xi1>, vector<8x1xf32>
    %c0_23 = arith.constant 0 : index
    %c7 = arith.constant 7 : index
    %60 = vector.load %arg6[%c0_23, %c7] : memref<8x128xf32, #tpu.memory_space<vmem>>, vector<8x1xf32>
    tpu.vector_store %arg6[%c0_23, %c7], %59 {strides = array<i32>} : memref<8x128xf32, #tpu.memory_space<vmem>>, vector<8x1xf32>,
    %c2_i32_24 = arith.constant 2 : i32
    %61 = tpu.dynamic_rotate %59 by %c2_i32_24 dim 0 : vector<8x1xf32>, i32 -> vector<8x1xf32>
    %c2_i32_25 = arith.constant 2 : i32
    %62 = vector.broadcast %c2_i32_25 : i32 to vector<8x1xi32>
    %63 = arith.cmpi sge, %27, %62 : vector<8x1xi32>
    %cst_26 = arith.constant 0.000000e+00 : f32
    %64 = vector.broadcast %cst_26 : f32 to vector<8x1xf32>
    %65 = arith.select %63, %61, %64 : vector<8x1xi1>, vector<8x1xf32>
    %c0_27 = arith.constant 0 : index
    %c3 = arith.constant 3 : index
    %66 = vector.load %arg6[%c0_27, %c3] : memref<8x128xf32, #tpu.memory_space<vmem>>, vector<8x1xf32>
    tpu.vector_store %arg6[%c0_27, %c3], %65 {strides = array<i32>} : memref<8x128xf32, #tpu.memory_space<vmem>>, vector<8x1xf32>,
    %c5_i32 = arith.constant 5 : i32
    %67 = tpu.dynamic_rotate %10 by %c5_i32 dim 0 : vector<8x128xf32>, i32 -> vector<8x128xf32>
    %68 = arith.mulf %10, %67 : vector<8x128xf32>
    %cst_28 = arith.constant dense<0.000000e+00> : vector<8xf32>
    %69 = vector.multi_reduction <add>, %68, %cst_28 [1] : vector<8x128xf32> to vector<8xf32>
    %70 = vector.shape_cast %69 : vector<8xf32> to vector<8x1xf32>
    %c3_i32 = arith.constant 3 : i32
    %71 = vector.broadcast %c3_i32 : i32 to vector<8x1xi32>
    %72 = arith.addi %27, %71 : vector<8x1xi32>
    %c8_i32_29 = arith.constant 8 : i32
    %73 = vector.broadcast %c8_i32_29 : i32 to vector<8x1xi32>
    %74 = arith.cmpi slt, %72, %73 : vector<8x1xi32>
    %cst_30 = arith.constant 0.000000e+00 : f32
    %75 = vector.broadcast %cst_30 : f32 to vector<8x1xf32>
    %76 = arith.select %74, %70, %75 : vector<8x1xi1>, vector<8x1xf32>
    %c0_31 = arith.constant 0 : index
    %c8 = arith.constant 8 : index
    %77 = vector.load %arg6[%c0_31, %c8] : memref<8x128xf32, #tpu.memory_space<vmem>>, vector<8x1xf32>
    tpu.vector_store %arg6[%c0_31, %c8], %76 {strides = array<i32>} : memref<8x128xf32, #tpu.memory_space<vmem>>, vector<8x1xf32>,
    %c3_i32_32 = arith.constant 3 : i32
    %78 = tpu.dynamic_rotate %76 by %c3_i32_32 dim 0 : vector<8x1xf32>, i32 -> vector<8x1xf32>
    %c3_i32_33 = arith.constant 3 : i32
    %79 = vector.broadcast %c3_i32_33 : i32 to vector<8x1xi32>
    %80 = arith.cmpi sge, %27, %79 : vector<8x1xi32>
    %cst_34 = arith.constant 0.000000e+00 : f32
    %81 = vector.broadcast %cst_34 : f32 to vector<8x1xf32>
    %82 = arith.select %80, %78, %81 : vector<8x1xi1>, vector<8x1xf32>
    %c0_35 = arith.constant 0 : index
    %c2 = arith.constant 2 : index
    %83 = vector.load %arg6[%c0_35, %c2] : memref<8x128xf32, #tpu.memory_space<vmem>>, vector<8x1xf32>
    tpu.vector_store %arg6[%c0_35, %c2], %82 {strides = array<i32>} : memref<8x128xf32, #tpu.memory_space<vmem>>, vector<8x1xf32>,
    %c4_i32 = arith.constant 4 : i32
    %84 = tpu.dynamic_rotate %10 by %c4_i32 dim 0 : vector<8x128xf32>, i32 -> vector<8x128xf32>
    %85 = arith.mulf %10, %84 : vector<8x128xf32>
    %cst_36 = arith.constant dense<0.000000e+00> : vector<8xf32>
    %86 = vector.multi_reduction <add>, %85, %cst_36 [1] : vector<8x128xf32> to vector<8xf32>
    %87 = vector.shape_cast %86 : vector<8xf32> to vector<8x1xf32>
    %c4_i32_37 = arith.constant 4 : i32
    %88 = vector.broadcast %c4_i32_37 : i32 to vector<8x1xi32>
    %89 = arith.addi %27, %88 : vector<8x1xi32>
    %c8_i32_38 = arith.constant 8 : i32
    %90 = vector.broadcast %c8_i32_38 : i32 to vector<8x1xi32>
    %91 = arith.cmpi slt, %89, %90 : vector<8x1xi32>
    %cst_39 = arith.constant 0.000000e+00 : f32
    %92 = vector.broadcast %cst_39 : f32 to vector<8x1xf32>
    %93 = arith.select %91, %87, %92 : vector<8x1xi1>, vector<8x1xf32>
    %c0_40 = arith.constant 0 : index
    %c9 = arith.constant 9 : index
    %94 = vector.load %arg6[%c0_40, %c9] : memref<8x128xf32, #tpu.memory_space<vmem>>, vector<8x1xf32>
    tpu.vector_store %arg6[%c0_40, %c9], %93 {strides = array<i32>} : memref<8x128xf32, #tpu.memory_space<vmem>>, vector<8x1xf32>,
    %c4_i32_41 = arith.constant 4 : i32
    %95 = tpu.dynamic_rotate %93 by %c4_i32_41 dim 0 : vector<8x1xf32>, i32 -> vector<8x1xf32>
    %c4_i32_42 = arith.constant 4 : i32
    %96 = vector.broadcast %c4_i32_42 : i32 to vector<8x1xi32>
    %97 = arith.cmpi sge, %27, %96 : vector<8x1xi32>
    %cst_43 = arith.constant 0.000000e+00 : f32
    %98 = vector.broadcast %cst_43 : f32 to vector<8x1xf32>
    %99 = arith.select %97, %95, %98 : vector<8x1xi1>, vector<8x1xf32>
    %c0_44 = arith.constant 0 : index
    %c1 = arith.constant 1 : index
    %100 = vector.load %arg6[%c0_44, %c1] : memref<8x128xf32, #tpu.memory_space<vmem>>, vector<8x1xf32>
    tpu.vector_store %arg6[%c0_44, %c1], %99 {strides = array<i32>} : memref<8x128xf32, #tpu.memory_space<vmem>>, vector<8x1xf32>,
    %c3_i32_45 = arith.constant 3 : i32
    %101 = tpu.dynamic_rotate %10 by %c3_i32_45 dim 0 : vector<8x128xf32>, i32 -> vector<8x128xf32>
    %102 = arith.mulf %10, %101 : vector<8x128xf32>
    %cst_46 = arith.constant dense<0.000000e+00> : vector<8xf32>
    %103 = vector.multi_reduction <add>, %102, %cst_46 [1] : vector<8x128xf32> to vector<8xf32>
    %104 = vector.shape_cast %103 : vector<8xf32> to vector<8x1xf32>
    %c5_i32_47 = arith.constant 5 : i32
    %105 = vector.broadcast %c5_i32_47 : i32 to vector<8x1xi32>
    %106 = arith.addi %27, %105 : vector<8x1xi32>
    %c8_i32_48 = arith.constant 8 : i32
    %107 = vector.broadcast %c8_i32_48 : i32 to vector<8x1xi32>
    %108 = arith.cmpi slt, %106, %107 : vector<8x1xi32>
    %cst_49 = arith.constant 0.000000e+00 : f32
    %109 = vector.broadcast %cst_49 : f32 to vector<8x1xf32>
    %110 = arith.select %108, %104, %109 : vector<8x1xi1>, vector<8x1xf32>
    %c0_50 = arith.constant 0 : index
    %c10 = arith.constant 10 : index
    %111 = vector.load %arg6[%c0_50, %c10] : memref<8x128xf32, #tpu.memory_space<vmem>>, vector<8x1xf32>
    tpu.vector_store %arg6[%c0_50, %c10], %110 {strides = array<i32>} : memref<8x128xf32, #tpu.memory_space<vmem>>, vector<8x1xf32>,
    %c5_i32_51 = arith.constant 5 : i32
    %112 = tpu.dynamic_rotate %110 by %c5_i32_51 dim 0 : vector<8x1xf32>, i32 -> vector<8x1xf32>
    %c5_i32_52 = arith.constant 5 : i32
    %113 = vector.broadcast %c5_i32_52 : i32 to vector<8x1xi32>
    %114 = arith.cmpi sge, %27, %113 : vector<8x1xi32>
    %cst_53 = arith.constant 0.000000e+00 : f32
    %115 = vector.broadcast %cst_53 : f32 to vector<8x1xf32>
    %116 = arith.select %114, %112, %115 : vector<8x1xi1>, vector<8x1xf32>
    %c0_54 = arith.constant 0 : index
    %c0_55 = arith.constant 0 : index
    %117 = vector.load %arg6[%c0_54, %c0_55] : memref<8x128xf32, #tpu.memory_space<vmem>>, vector<8x1xf32>
    tpu.vector_store %arg6[%c0_54, %c0_55], %116 {strides = array<i32>} : memref<8x128xf32, #tpu.memory_space<vmem>>, vector<8x1xf32>,
    %c0_56 = arith.constant 0 : index
    %c0_57 = arith.constant 0 : index
    %118 = vector.load %arg6[%c0_56, %c0_57] : memref<8x128xf32, #tpu.memory_space<vmem>>, vector<8x128xf32>
    %c0_58 = arith.constant 0 : index
    %c0_59 = arith.constant 0 : index
    %119 = vector.load %arg3[%c0_58, %c0_59] : memref<128x128xf32, #tpu.memory_space<vmem>>, vector<128x128xf32>
    %cst_60 = arith.constant dense<0.000000e+00> : vector<8x128xf32>
    %120 = tpu.matmul %118, %119, %cst_60 {dimension_numbers = #tpu.dot_dimension_numbers<[1], [0], [0], [1], [0, 0, 1, 1], [], []>} : vector<8x128xf32>, vector<128x128xf32>, vector<8x128xf32> -> vector<8x128xf32>
    %c0_61 = arith.constant 0 : index
    %c0_62 = arith.constant 0 : index
    %121 = vector.load %arg4[%c0_61, %c0_62] : memref<1x128xf32, #tpu.memory_space<vmem>>, vector<1x128xf32>
    %122 = vector.broadcast %121 : vector<1x128xf32> to vector<8x128xf32>
    %123 = arith.addf %120, %122 : vector<8x128xf32>
    %cst_63 = arith.constant 0.000000e+00 : f32
    %124 = vector.broadcast %cst_63 : f32 to vector<8x128xf32>
    %125 = arith.maximumf %123, %124 : vector<8x128xf32>
    %c0_64 = arith.constant 0 : index
    %c0_65 = arith.constant 0 : index
    %126 = vector.load %arg5[%c0_64, %c0_65] : memref<8x128xf32, #tpu.memory_space<vmem>>, vector<8x128xf32>
    tpu.vector_store %arg5[%c0_64, %c0_65], %125 {strides = array<i32>} : memref<8x128xf32, #tpu.memory_space<vmem>>, vector<8x128xf32>,
    return
  }
  func.func @transform_0(%arg0: i32) -> (i32, i32) {
    %c0_i32 = arith.constant 0 : i32
    %c0_i32_0 = arith.constant 0 : i32
    return %arg0, %c0_i32 : i32, i32
  }
  func.func @transform_1(%arg0: i32) -> (i32, i32) {
    %c0_i32 = arith.constant 0 : i32
    %c0_i32_0 = arith.constant 0 : i32
    %c0_i32_1 = arith.constant 0 : i32
    return %c0_i32, %c0_i32_0 : i32, i32
  }
  func.func @transform_2(%arg0: i32) -> (i32, i32) {
    %c0_i32 = arith.constant 0 : i32
    %c0_i32_0 = arith.constant 0 : i32
    %c0_i32_1 = arith.constant 0 : i32
    return %c0_i32, %c0_i32_0 : i32, i32
  }
  func.func @transform_3(%arg0: i32) -> (i32, i32) {
    %c0_i32 = arith.constant 0 : i32
    %c0_i32_0 = arith.constant 0 : i32
    %c0_i32_1 = arith.constant 0 : i32
    return %c0_i32, %c0_i32_0 : i32, i32
  }
  func.func @transform_4(%arg0: i32) -> (i32, i32) {
    %c0_i32 = arith.constant 0 : i32
    %c0_i32_0 = arith.constant 0 : i32
    return %arg0, %c0_i32 : i32, i32
  }
}

</mosaic_0001>

<bundles_post_ra>
// kernel: tpu_custom_call.1
= control target key start
LH: loop header
LB: loop body
LE: loop exit
PB: predicated region body
PF: predicated region fallthrough
CT: control target
= control target key end

     0   :  { %9 = vsyncpa [#allocation4], 0  ;;  %s981_s0 = inlined_call_operand.vmem [shape: f32[16,8], index: 0, kind: input, shape index: {}]   ;;  %s982_s1 = inlined_call_operand.vmem [shape: f32[8,128], index: 1, kind: input, shape index: {}]   ;;  %s983_s2 = inlined_call_operand.hbm [shape: f32[128,128], index: 2, kind: input, shape index: {}]   ;;  %s984_s3 = inlined_call_operand.vmem [shape: f32[1,128], index: 3, kind: input, shape index: {}]   ;;  %s985_s4 = inlined_call_operand.hbm [shape: f32[16,128], index: 4, kind: output, shape index: {}]  }
   0x1   :  { %10 = vsyncpa [#allocation5], 0 }
   0x2   :  { %12 = vsyncpa [#allocation5 + $0x1], 0  ;;  %s837_s15 = smov 0   ;;  %s839_s16 = smov 0  }
   0x3   :  { %s841_s17 = smov 0   ;;  %s843_s18 = smov 0  }
   0x4 LB: > { %s858_s19 = sadd.s32 4294967295, %s800_s18   ;;  %s577_s20 = sadd.s32 4294967294, %s800_s18   ;;  %s800_s18 = sphi %s843_s18, %s993_s18   ;;  %s796_s17 = sphi %s841_s17, %s992_s17   ;;  %s792_s16 = sphi %s839_s16, %s991_s16   ;;  %s788_s15 = sphi %s837_s15, %s990_s15  }
   0x5   : > { %s862_s21 = sadd.s32 1, %s800_s18   ;;  %s114_s22 = sadd.s32 1, %s796_s17 }
   0x6   : > { %s111_s23 = ssub.s32 %s800_s18, %s862_s21  ;;  %p124_p0 = scmp.ne.s32.totalorder %s796_s17, %s792_s16 }
   0x7   : > { %p112_p1 = scmp.eq.s32.totalorder %s111_s23, 0  ;;  %p125_p2 = scmp.eq.s32.totalorder %s858_s19, 1 }
   0x8   : > { %p130_p3 = scmp.ne.s32.totalorder %s792_s16, %s788_s15  ;;  %p131_p4 = scmp.eq.s32.totalorder %s577_s20, 1 }
   0x9   : > { %s873_s24 = scalar_select %p112_p1, %s796_s17, %s114_s22  }
   0xa   : > { %p875_p5 = por %p125_p2, %p124_p0  ;;  %p879_p6 = por %p131_p4, %p130_p3 }
   0xb   : > { %p578_p7 = scmp.ge.s32.totalorder %s800_s18, 1  ;;  %p138_p8 = scmp.lt.s32.totalorder %s800_s18, 3 }
   0xc   : > { %s987_s26 = scalar_select %p879_p6, 1, 0 }
   0xd   : > { %p664_p9 = scmp.eq.s32.totalorder %s858_s19, 0  ;;  %p886_p10 = pnand %p578_p7, %p138_p8 }
   0xe   : > { %s802_s28 = smov [#allocation3]  }
   0xf   : > { %s153_s29 = sshll.u32 %s802_s28, 4  ;;  %p656_p11 = pneg %p886_p10  ;;  %s154_s29 = int_to_ptr.vmem [resolvable:$true] %s153_s29 }
  0x10   : > { %s721_s30 = scalar_lea.vmem %s154_s29, 2048  ;;  %p729_p3 = scmp.lt.s32.totalorder %s154_s29, %s154_s29 }
  0x11   : > { %p657_p12 = pnand %p664_p9, %p656_p11  ;;  %p722_p0 = scmp.ne.s32.totalorder %s154_s29, %s721_s30 }
  0x12   : > { %p730_p4 = scmp.lt.s32.totalorder %s721_s30, %s721_s30 }
  0x13   : > { %p712_p13 = pneg %p657_p12 }
  0x14   : > { %p731_p6 = por %p730_p4, %p729_p3 }
  0x15   : > { %p724_p1 = pnand %p722_p0, %p712_p13 }
  0x17   : > { %p725_p2 = pneg %p724_p1 }
  0x19   : > { %p732_p7 = pnand %p731_p6, %p725_p2 }
  0x1b   : > { %735 = shalt.err (!%p732_p7)
}
  0x1c   : > { %s803_s5 = smov 128   ;;  %s804_s6 = smov 8  }
  0x1d   : > { %659 = dma.hbm_to_vmem [thread:$0]  (!%p657_p12), %s983_s2, 2048, %s154_s29, [#allocation4], %s803_s5, %s803_s5, %s804_s6  }
  0x1e   : > { %179 = sbr.rel (%p886_p10) target bundleno = 883 (0x373), region = 36 }
  0x23   : > { %779 = dma.done.wait (%p664_p9), [#allocation4], 2048  }
  0x24   : > { %781 = vsyncadd (%p664_p9), [#allocation4], 4294965248  ;;  %p204_p8 = scmp.lt.s32.totalorder %s858_s19, 1  ;;  %v805_v0 = vmov 0.0   ;;  %vm806_vm0 = vmmov 0   ;;  %vm210_vm1 = vcmask 64512   ;;  %v290_v29 = vlaneseq }
  0x25   : > { %610 = vmatprep.subr.mxu0 %v805_v0  ;;  %612 = vmatprep.mubr.msk.f32.mxu0 %vm806_vm0, %v805_v0  ;;  %v209_v1 = vld [vmem:[%s982_s1] sm:$0xff]  ;;  %vm304_vm2 = vcmask 1047640   ;;  %vm308_vm3 = vcmask 48168   ;;  %v411_v23 = vld [vmem:[#allocation3 + $0x70] sm:$0xff]  ;;  %v410_v24 = vld [vmem:[#allocation3 + $0x68] sm:$0xff]  ;;  %vm317_vm6 = vcmask 56368  }
  0x26   : > { %s205_s9 = scalar_select %p204_p8, %s858_s19, 1  ;;  %615 = vmatprep.subr.mxu1 %v805_v0  ;;  %647 = vmatprep.mubr.msk.f32.mxu1 %vm806_vm0, %v805_v0  ;;  %305 = vst.msk [vmem:[#allocation2] sm:$0xff] %vm304_vm2, %v805_v0  ;;  %v412_v22 = vld [vmem:[#allocation3 + $0x78] sm:$0xff]  ;;  %v409_v25 = vld [vmem:[#allocation3 + $0x60] sm:$0xff]  ;;  %v407_v27 = vld [vmem:[#allocation3 + $0x50] sm:$0xff]  ;;  %v291_v30 = vshrl.u32 %v290_v29, 7 }
  0x27   : > { %611 = vmatpush3.msra.mxu0 %v209_v1  ;;  %616 = vmatpush3.msra.mxu1 %v412_v22  ;;  %v408_v26 = vld [vmem:[#allocation3 + $0x58] sm:$0xff]  ;;  %v406_v28 = vld [vmem:[#allocation3 + $0x48] sm:$0xff]  ;;  %v405_v32 = vld [vmem:[#allocation3 + $0x40] sm:$0xff]  ;;  %s807_s22 = smov 3   ;;  %s808_s23 = smov 4   ;;  %vm326_vm13 = vcmask 39968  }
  0x28   : > { %s584_s10 = sshll.u32 %s205_s9, 3  ;;  %617 = vmatprep.subr.mxu1 %v805_v0  ;;  %v923_v31 = vand.u32 7, %v291_v30  ;;  %v404_v33 = vld [vmem:[#allocation3 + $0x38] sm:$0xff]  ;;  %v403_v37 = vld [vmem:[#allocation3 + $0x30] sm:$0xff]  ;;  %v402_v38 = vld [vmem:[#allocation3 + $0x28] sm:$0xff]  ;;  %s809_s27 = smov 2  }
  0x29   : > { %s207_s13 = scalar_lea.vmem %s981_s0, %s584_s10  ;;  %618 = vmatpush3.msra.mxu1 %v411_v23  ;;  %v401_v44 = vld [vmem:[#allocation3 + $0x20] sm:$0xff]  ;;  %v400_v47 = vld [vmem:[#allocation3 + $0x18] sm:$0xff]  ;;  %v399_v52 = vld [vmem:[#allocation3 + $0x10] sm:$0xff]  ;;  %s810_s28 = smov 1   ;;  %vm335_vm14 = vcmask 64568   ;;  %vm344_vm0 = vcmask 31768  }
  0x2a   : > { %v208_v2 = vld [vmem:[%s207_s13] sm:$0xff]  ;;  %619 = vmatprep.subr.mxu1 %v805_v0  ;;  %v332_v34 = vadd.s32 2, %v923_v31  ;;  %v314_v35 = vadd.s32 1, %v923_v31  ;;  %v350_v36 = vadd.s32 3, %v923_v31  ;;  %v368_v39 = vadd.s32 4, %v923_v31  ;;  %v398_v56 = vld [vmem:[#allocation3 + $0x8] sm:$0xff] }
  0x2b   : > { %613 = vmatmul.mubr.msk.f32.vlgmr.msra.gmra.mxu0 %vm210_vm1, %v208_v2  ;;  %620 = vmatpush3.msra.mxu1 %v410_v24  ;;  %vm338_vm8 = vcmp.ge.s32.totalorder %v923_v31, 2  ;;  %vm320_vm9 = vcmp.ge.s32.totalorder %v923_v31, 1  ;;  %vm356_vm11 = vcmp.ge.s32.totalorder %v923_v31, 3  ;;  %v397_v59 = vld [vmem:[#allocation3] sm:$0xff]  ;;  %vm374_vm12 = vcmp.ge.s32.totalorder %v923_v31, 4  ;;  %s201_s29 = sand.u32 1, %s792_s16  }
  0x2c   : > { %621 = vmatprep.subr.mxu1 %v805_v0  ;;  %vm333_vm4 = vcmp.lt.s32.totalorder %v332_v34, 8  ;;  %vm315_vm5 = vcmp.lt.s32.totalorder %v314_v35, 8  ;;  %vm351_vm7 = vcmp.lt.s32.totalorder %v350_v36, 8  ;;  %vm369_vm10 = vcmp.lt.s32.totalorder %v368_v39, 8  ;;  %s583_s30 = sshll.u32 %s201_s29, 3  ;;  %s588_s7 = sshll.u32 %s858_s19, 7 }
  0x2d   : > { %622 = vmatpush3.msra.mxu1 %v409_v25  ;;  %v386_v61 = vadd.s32 5, %v923_v31  ;;  %vm353_vm1 = vcmask 72768   ;;  %vm362_vm2 = vcmask 23568   ;;  %s203_s8 = scalar_lea.vmem [#allocation6], %s583_s30  ;;  %s504_s12 = scalar_lea.hbm %s985_s4, %s588_s7 }
  0x2e   : > { %623 = vmatprep.subr.mxu1 %v805_v0  ;;  %s506_s9 = sshll.u32 %s203_s8, 4  ;;  %s493_s13 = scalar_lea.sflag [#allocation5], %s201_s29  ;;  %s507_s9 = int_to_ptr.vmem [resolvable:$true] %s506_s9 }
  0x2f   : > { %624 = vmatpush3.msra.mxu1 %v408_v26  ;;  %vm387_vm15 = vcmp.lt.s32.totalorder %v386_v61, 8  ;;  %s736_s14 = scalar_lea.vmem %s507_s9, 128  ;;  %s811_s20 = smov [#allocation6]  }
  0x30   : > { %625 = vmatprep.subr.mxu1 %v805_v0  ;;  %p737_p6 = scmp.ne.s32.totalorder %s507_s9, %s736_s14 }
  0x31   : > { %626 = vmatpush3.msra.mxu1 %v407_v27 }
  0x32   : > { %627 = vmatprep.subr.mxu1 %v805_v0  ;;  %p738_p9 = pnand %p737_p6, %p875_p5 }
  0x33   : > { %628 = vmatpush3.msra.mxu1 %v406_v28 }
  0x34   : > { %629 = vmatprep.subr.mxu1 %v805_v0  ;;  %p739_p10 = pneg %p738_p9 }
  0x35   : > { %630 = vmatpush3.msra.mxu1 %v405_v32 }
  0x36   : > { %631 = vmatprep.subr.mxu1 %v805_v0 }
  0x37   : > { %632 = vmatpush3.msra.mxu1 %v404_v33 }
  0x38   : > { %633 = vmatprep.subr.mxu1 %v805_v0 }
  0x39   : > { %634 = vmatpush3.msra.mxu1 %v403_v37 }
  0x3a   : > { %635 = vmatprep.subr.mxu1 %v805_v0 }
  0x3b   : > { %636 = vmatpush3.msra.mxu1 %v402_v38 }
  0x3c   : > { %637 = vmatprep.subr.mxu1 %v805_v0 }
  0x3d   : > { %638 = vmatpush3.msra.mxu1 %v401_v44 }
  0x3e   : > { %639 = vmatprep.subr.mxu1 %v805_v0 }
  0x3f   : > { %640 = vmatpush3.msra.mxu1 %v400_v47 }
  0x40   : > { %641 = vmatprep.subr.mxu1 %v805_v0 }
  0x41   : > { %642 = vmatpush3.msra.mxu1 %v399_v52 }
  0x42   : > { %643 = vmatprep.subr.mxu1 %v805_v0 }
  0x43   : > { %644 = vmatpush3.msra.mxu1 %v398_v56 }
  0x44   : > { %645 = vmatprep.subr.mxu1 %v805_v0 }
  0x45   : > { %646 = vmatpush3.msra.mxu1 %v397_v59 }
  0xeb   : > { %v280_v3 = vpop.f32.mrf.mxu0 }
  0xec   : > { %v284_v4 = vmul.f32 %v280_v3, %v280_v3 }
  0xed   : > { %v614_v5 = vpop.f32.mrf.mxu0 }
  0xee   : > { %285 = vadd.xlane.f32.xlu0 %v284_v4 }
 0x177   : > { %v286_v6 = vpop.xlane.xlu0 %285 }
 0x178   : > { %v287_v7 = vmax.f32 %v286_v6, 1e-24 }
 0x17a   : > { %708 = vrsqrt.f32 %v287_v7  ;;  %v586_v7 = vld [vmem:[%s984_s3] ss:$0 sm:$0xff] }
 0x187   : > { %v709_v8 = vpop.eup %708 }
 0x188   : > { %v289_v9 = vmul.f32 %v709_v8, %v280_v3  ;;  %v306_v10 = vmul.f32 %v709_v8, %v709_v8 }
 0x18a   : > { %v307_v11 = vmul.f32 %v306_v10, %v286_v6  ;;  %v328_v12 = vrot.slane %v289_v9, 2  ;;  %v310_v13 = vrot.slane %v289_v9, 1  ;;  %v346_v16 = vrot.slane %v289_v9, 3 }
 0x18b   : > { %v364_v17 = vrot.slane %v289_v9, 4  ;;  %v382_v20 = vrot.slane %v289_v9, 5 }
 0x18c   : > { %v329_v14 = vmul.f32 %v328_v12, %v289_v9  ;;  %v311_v15 = vmul.f32 %v310_v13, %v289_v9  ;;  %309 = vst.msk [vmem:[#allocation2] sm:$0xff] %vm308_vm3, %v307_v11  ;;  %v347_v18 = vmul.f32 %v346_v16, %v289_v9  ;;  %vm371_vm3 = vcmask 80968  }
 0x18d   : > { %v365_v19 = vmul.f32 %v364_v17, %v289_v9  ;;  %v383_v21 = vmul.f32 %v382_v20, %v289_v9 }
 0x18e   : > { %330 = vadd.xlane.f32.xlu1 %v329_v14  ;;  %312 = vadd.xlane.f32.xlu0 %v311_v15 }
 0x192   : > { %348 = vadd.xlane.f32.xlu1 %v347_v18  ;;  %366 = vadd.xlane.f32.xlu0 %v365_v19 }
 0x196   : > { %384 = vadd.xlane.f32.xlu1 %v383_v21 }
 0x217   : > { %v331_v40 = vpop.xlane.xlu1 %330  ;;  %v313_v41 = vpop.xlane.xlu0 %312 }
 0x218   : > { %v334_v42 = vsel %vm333_vm4, %v331_v40, 0.0  ;;  %v316_v43 = vsel %vm315_vm5, %v313_v41, 0.0  ;;  %vm380_vm4 = vcmask 15368   ;;  %vm392_vm5 = vcmp.ge.s32.totalorder %v923_v31, 5 }
 0x219   : > { %v337_v45 = vrot.slane %v334_v42, 6  ;;  %318 = vst.msk [vmem:[#allocation2] sm:$0xff] %vm317_vm6, %v316_v43  ;;  %v319_v46 = vrot.slane %v316_v43, 7  ;;  %vm389_vm6 = vcmask 89168  }
 0x21b   : > { %v349_v48 = vpop.xlane.xlu1 %348  ;;  %v367_v49 = vpop.xlane.xlu0 %366  ;;  %v339_v50 = vsel %vm338_vm8, %v337_v45, 0.0  ;;  %v321_v51 = vsel %vm320_vm9, %v319_v46, 0.0 }
 0x21c   : > { %v352_v53 = vsel %vm351_vm7, %v349_v48, 0.0  ;;  %v370_v54 = vsel %vm369_vm10, %v367_v49, 0.0  ;;  %341 = vrot.lane.b32.xlu1 %v339_v50, %s807_s22  ;;  %323 = vrot.lane.b32.xlu0 %v321_v51, %s808_s23  ;;  %vm394_vm7 = vcmask 7168   ;;  %s740_s22 = sshll.u32 %s811_s20, 4  ;;  %s741_s22 = int_to_ptr.vmem [resolvable:$false] %s740_s22 }
 0x21d   : > { %v355_v55 = vrot.slane %v352_v53, 5  ;;  %v373_v57 = vrot.slane %v370_v54, 4  ;;  %s742_s19 = scalar_lea.vmem %s741_s22, 256  ;;  %p743_p11 = scmp.lt.s32.totalorder %s507_s9, %s741_s22 }
 0x21e   : > { %p744_p12 = scmp.lt.s32.totalorder %s742_s19, %s736_s14 }
 0x21f   : > { %v357_v58 = vsel %vm356_vm11, %v355_v55, 0.0  ;;  %v375_v60 = vsel %vm374_vm12, %v373_v57, 0.0  ;;  %v385_v62 = vpop.xlane.xlu1 %384 }
 0x220   : > { %359 = vrot.lane.b32.xlu1 %v357_v58, %s809_s27  ;;  %v388_v2 = vsel %vm387_vm15, %v385_v62, 0.0  ;;  %p745_p13 = por %p744_p12, %p743_p11 }
 0x221   : > { %v391_v3 = vrot.slane %v388_v2, 3 }
 0x222   : > { %p746_p0 = pnand %p745_p13, %p739_p10 }
 0x223   : > { %v393_v5 = vsel %vm392_vm5, %v391_v3, 0.0 }
 0x224   : > { %377 = vrot.lane.b32.xlu1 %v375_v60, %s810_s28 }
 0x28e   : > { %v342_v63 = vpop.permute.xlu1 %341  ;;  %v324_v1 = vpop.permute.xlu0 %323 }
 0x28f   : > { %327 = vst.msk [vmem:[#allocation2] sm:$0xff] %vm326_vm13, %v324_v1 }
 0x290   : > { %336 = vst.msk [vmem:[#allocation2] sm:$0xff] %vm335_vm14, %v334_v42 }
 0x291   : > { %345 = vst.msk [vmem:[#allocation2] sm:$0xff] %vm344_vm0, %v342_v63 }
 0x292   : > { %v360_v0 = vpop.permute.xlu1 %359  ;;  %354 = vst.msk [vmem:[#allocation2] sm:$0xff] %vm353_vm1, %v352_v53 }
 0x293   : > { %363 = vst.msk [vmem:[#allocation2] sm:$0xff] %vm362_vm2, %v360_v0 }
 0x294   : > { %372 = vst.msk [vmem:[#allocation2] sm:$0xff] %vm371_vm3, %v370_v54 }
 0x296   : > { %v378_v4 = vpop.permute.xlu1 %377 }
 0x297   : > { %381 = vst.msk [vmem:[#allocation2] sm:$0xff] %vm380_vm4, %v378_v4 }
 0x298   : > { %390 = vst.msk [vmem:[#allocation2] sm:$0xff] %vm389_vm6, %v388_v2 }
 0x299   : > { %395 = vst.msk [vmem:[#allocation2] sm:$0xff] %vm394_vm7, %v393_v5 }
 0x2a0   : > { %v396_v6 = vld [vmem:[#allocation2] sm:$0xff] }
 0x2a1   : > { %648 = vmatmul.mubr.f32.vlgmr.msra.gmra.mxu1 %v396_v6 }
 0x361   : > { %v486_v8 = vpop.f32.mrf.mxu1 }
 0x362   : > { %v487_v9 = vadd.f32 %v586_v7, %v486_v8 }
 0x363   : > { %v649_v10 = vpop.f32.mrf.mxu1 }
 0x364   : > { %v490_v11 = vmax.f32 %v487_v9, 0.0 }
 0x366   : > { %491 = vst [vmem:[%s203_s8] sm:$0xff] %v490_v11 }
 0x367   : > { %749 = shalt.err (!%p746_p0)
}
 0x368   : > { %s750_s23 = scalar_lea.hbm %s504_s12, 128  ;;  %s754_s29 = scalar_lea.hbm %s985_s4, 256 }
 0x369   : > { %p751_p1 = scmp.ne.s32.totalorder %s504_s12, %s750_s23  ;;  %p755_p4 = scmp.lt.s32.totalorder %s504_s12, %s985_s4 }
 0x36a   : > { %p756_p7 = scmp.lt.s32.totalorder %s754_s29, %s750_s23 }
 0x36b   : > { %p752_p2 = pnand %p751_p1, %p875_p5 }
 0x36c   : > { %p757_p8 = por %p756_p7, %p755_p4 }
 0x36d   : > { %p753_p3 = pneg %p752_p2 }
 0x36f   : > { %p758_p6 = pnand %p757_p8, %p753_p3 }
 0x371   : > { %761 = shalt.err (!%p758_p6)
}
 0x372   : > { %654 = dma.vmem_to_hbm [thread:$0]  (%p875_p5), %s507_s9, 128, %s504_s12, %s493_s13  }
 0x373 PF: > { %p666_p9 = scmp.ge.s32.totalorder %s800_s18, 2  ;;  %s518_s6 = sand.u32 1, %s788_s15  }
 0x374   : > { %p989_p10 = scmp.ne.s32.totalorder %s987_s26, 0  ;;  %s519_s7 = scalar_lea.sflag [#allocation5], %s518_s6 }
 0x376   : > { %p661_p11 = pnand %p666_p9, %p989_p10 }
 0x378   : > { %p662_p12 = pneg %p661_p11 }
 0x37a   : > { %783 = dma.done.wait (%p662_p12), %s519_s7, 128  }
 0x37b   : > { %785 = vsyncadd (%p662_p12), %s519_s7, 4294967168  ;;  %p15_p13 = scmp.ge.s32.totalorder %s862_s21, 4   ;;  %s990_s15 = smov %s792_s16 }
 0x37c   : > { %s991_s16 = smov %s796_s17  ;;  %s992_s17 = smov %s873_s24 }
 0x37d   : > { %s993_s18 = smov %s862_s21  ;;  %17 = sbr.rel (!%p15_p13) target bundleno = 4 (0x4), region = 76 }
 0x382   :  { %524 = vsyncpa [#allocation4], 1 }
 0x383   :  { %526 = vsyncpa [#allocation4 + $0x1], 1 }
 0x384   :  { %527 = vsyncpa [#allocation5], 1 }
 0x385   :  { %529 = vsyncpa [#allocation5 + $0x1], 1 }

</bundles_post_ra>
